<compile_context>
chip_gen: v7x
topology: tpu7x:2x2x1
jax: 0.10.0
libtpu: 0.0.40
codegen_flags: <defaults>
</compile_context>

<pallas_src>
import functools

import jax
import jax.numpy as jnp
from jax.experimental import pallas as pl
from jax.experimental.pallas import tpu as pltpu

_HIDDEN = 512
_NEG_SLOPE = 0.01                     # PyTorch F.leaky_relu default
_VMEM_BUDGET_BYTES = 48 * 2 ** 20     # conservative: fits v7x's 64 MiB physical
_VMEM_RAISE_THRESHOLD = 12 * 2 ** 20  # below v5e's 16 MiB default scoped limit


def _round_up(n, m):
    return ((n + m - 1) // m) * m


def _dqn_kernel(x_ref, w1_ref, b1_ref, w2_ref, b2_ref, o_ref):
    # Layer 1 on the MXU: bf16 operands (no-op cast if x already bf16), f32 acc.
    x = x_ref[...].astype(jnp.bfloat16)
    h = jnp.dot(x, w1_ref[...], preferred_element_type=jnp.float32) + b1_ref[...]
    # LeakyReLU(0.01): one mul + one max on the f32 VPU path.
    h = jnp.maximum(h, _NEG_SLOPE * h)
    # Layer 2 on the MXU (128-padded columns), f32 accumulation + f32 bias.
    out = jnp.dot(h.astype(jnp.bfloat16), w2_ref[...],
                  preferred_element_type=jnp.float32) + b2_ref[...]
    # Slice the zero-padded lanes off in-register; only real columns hit HBM.
    o_ref[...] = out[:, : o_ref.shape[1]].astype(o_ref.dtype)


def prepare_params(l1_w, l1_b, l2_w, l2_b):
    """One-time parameter prep (call at param-load time, NOT per forward).

    Takes PyTorch-layout params: l1_w (512, in), l1_b (512,), l2_w (out, 512),
    l2_b (out,).  Returns ((w1, b1, w2p, b2p), out_features) where weights are
    bf16, transposed to (in, out), and layer 2 is zero-padded to a multiple of
    128 columns for dense MXU lanes.
    """
    hidden, in_features = l1_w.shape
    out_features, hidden2 = l2_w.shape
    assert hidden == _HIDDEN and hidden2 == _HIDDEN

    w1 = jnp.asarray(l1_w, jnp.bfloat16).T                      # (in, 512)
    b1 = jnp.asarray(l1_b, jnp.float32).reshape(1, hidden)      # (1, 512)
    w2 = jnp.asarray(l2_w, jnp.bfloat16).T                      # (512, out)
    b2 = jnp.asarray(l2_b, jnp.float32).reshape(1, out_features)

    out_padded = max(128, _round_up(out_features, 128))
    if out_padded != out_features:
        w2 = jnp.zeros((hidden, out_padded), jnp.bfloat16).at[:, :out_features].set(w2)
        b2 = jnp.zeros((1, out_padded), jnp.float32).at[:, :out_features].set(b2)

    return (w1, b1, w2, b2), out_features


@functools.partial(jax.jit, static_argnames=("out_features", "block_b"))
def dqn_forward(x, w1, b1, w2, b2, *, out_features, block_b=512):
    """Fused forward pass.

    x:  [B, in_features]  (f32 or bf16)
    w1: [in_features, 512] bf16, b1: [1, 512] f32
    w2: [512, out_padded]  bf16, b2: [1, out_padded] f32   (from prepare_params)
    returns [B, out_features] f32
    """
    B, in_features = x.shape
    hidden, out_padded = w2.shape
    assert hidden == _HIDDEN and w1.shape == (in_features, hidden)
    assert out_features <= out_padded

    # --- batch tile selection -------------------------------------------------
    # >=2 grid steps for B>=16 so both TensorCores get work on v7x (no effect on
    # single-TC v5e/v6e); multiple of 8 sublanes; capped at block_b.
    if B >= 16:
        tB = _round_up(-(-B // 2), 8)
    else:
        tB = _round_up(B, 8)
    tB = min(block_b, tB)

    # Weight/bias blocks are grid-invariant (constant index_maps -> fetched once
    # and kept VMEM-resident); count them double-buffered to stay conservative.
    weight_bytes = 2 * (w1.size * w1.dtype.itemsize + b1.size * b1.dtype.itemsize
                        + w2.size * w2.dtype.itemsize + b2.size * b2.dtype.itemsize)

    def footprint(t):
        x_bytes = 2 * t * in_features * x.dtype.itemsize        # double-buffered x
        o_bytes = 2 * t * out_features * 4                      # double-buffered out
        tmp_bytes = t * hidden * (4 + 2) + t * out_padded * 4   # h f32 + h bf16 + out f32
        return weight_bytes + x_bytes + o_bytes + tmp_bytes

    # Shrink the tile if it would not fit a v7x-safe VMEM budget.
    while tB > 8 and footprint(tB) > _VMEM_BUDGET_BYTES:
        tB = max(8, _round_up(tB // 2, 8))

    grid = (pl.cdiv(B, tB),)  # partial trailing block handled by Pallas (no x pad copy)

    comp_kwargs = dict(dimension_semantics=("parallel",))
    est = footprint(tB)
    if est > _VMEM_RAISE_THRESHOLD:
        # Default scoped VMEM is 16 MiB (v5e) / 32 MiB (v6e/v7x); raise it
        # explicitly, staying under v7x's 64 MiB physical.
        comp_kwargs["vmem_limit_bytes"] = min(int(2 * est), 56 * 2 ** 20)

    cost = pl.CostEstimate(
        flops=2 * B * (in_features * hidden + hidden * out_padded),
        transcendentals=0,
        bytes_accessed=(x.size * x.dtype.itemsize
                        + w1.size * w1.dtype.itemsize + b1.size * b1.dtype.itemsize
                        + w2.size * w2.dtype.itemsize + b2.size * b2.dtype.itemsize
                        + B * out_features * 4),
    )

    return pl.pallas_call(
        _dqn_kernel,
        out_shape=jax.ShapeDtypeStruct((B, out_features), jnp.float32),
        grid=grid,
        in_specs=[
            pl.BlockSpec((tB, in_features), lambda i: (i, 0)),     # streamed x tile
            pl.BlockSpec((in_features, hidden), lambda i: (0, 0)),  # w1 (resident)
            pl.BlockSpec((1, hidden), lambda i: (0, 0)),            # b1 (resident)
            pl.BlockSpec((hidden, out_padded), lambda i: (0, 0)),   # w2 (resident, padded)
            pl.BlockSpec((1, out_padded), lambda i: (0, 0)),        # b2 (resident, padded)
        ],
        out_specs=pl.BlockSpec((tB, out_features), lambda i: (i, 0)),
        compiler_params=pltpu.CompilerParams(**comp_kwargs),
        cost_estimate=cost,
    )(x, w1, b1, w2, b2)


def init_params(key, in_features, out_features, hidden=_HIDDEN):
    """PyTorch nn.Linear default init (uniform +-1/sqrt(fan_in)), PyTorch layout."""
    k1, k2, k3, k4 = jax.random.split(key, 4)
    bound1 = 1.0 / (in_features ** 0.5)
    bound2 = 1.0 / (hidden ** 0.5)
    l1_w = jax.random.uniform(k1, (hidden, in_features), jnp.float32, -bound1, bound1)
    l1_b = jax.random.uniform(k2, (hidden,), jnp.float32, -bound1, bound1)
    l2_w = jax.random.uniform(k3, (out_features, hidden), jnp.float32, -bound2, bound2)
    l2_b = jax.random.uniform(k4, (out_features,), jnp.float32, -bound2, bound2)
    return l1_w, l1_b, l2_w, l2_b


def dqn_reference(x, l1_w, l1_b, l2_w, l2_b):
    """Reference using the same numerics as the kernel (bf16 operands, f32 acc)."""
    w1 = l1_w.astype(jnp.bfloat16).T
    w2 = l2_w.astype(jnp.bfloat16).T
    h = jnp.dot(x.astype(jnp.bfloat16), w1,
                preferred_element_type=jnp.float32) + l1_b[None, :]
    h = jnp.where(h >= 0, h, _NEG_SLOPE * h)
    return jnp.dot(h.astype(jnp.bfloat16), w2,
                   preferred_element_type=jnp.float32) + l2_b[None, :]


if __name__ == "__main__":
    key = jax.random.PRNGKey(0)
    kx, kx2, kp = jax.random.split(key, 3)

    batch = 8
    in_features = 32     # "inputs" arg of DqnNetwork
    out_features = 8     # "outputs" arg of DqnNetwork

    l1_w, l1_b, l2_w, l2_b = init_params(kp, in_features, out_features)
    params, n_out = prepare_params(l1_w, l1_b, l2_w, l2_b)   # one-time prep

    x = jax.random.normal(kx, (batch, in_features), jnp.float32)
    out = jax.block_until_ready(dqn_forward(x, *params, out_features=n_out))
    assert out.shape == (batch, out_features)

    ref = dqn_reference(x, l1_w, l1_b, l2_w, l2_b)
    assert jnp.allclose(out, ref, atol=2e-3, rtol=2e-3)

    # Loose sanity check vs the exact-f32 PyTorch math (weights were bf16-cast).
    h32 = x @ l1_w.T + l1_b[None, :]
    h32 = jnp.where(h32 >= 0, h32, _NEG_SLOPE * h32)
    ref32 = h32 @ l2_w.T + l2_b[None, :]
    assert jnp.allclose(out, ref32, atol=5e-2, rtol=5e-2)

    # Ragged batch (not a multiple of the tile): exercises the no-pad partial
    # trailing block and the >=2-step parallel grid.
    x2 = jax.random.normal(kx2, (20, in_features), jnp.float32)
    out2 = jax.block_until_ready(dqn_forward(x2, *params, out_features=n_out))
    assert out2.shape == (20, out_features)
    ref2 = dqn_reference(x2, l1_w, l1_b, l2_w, l2_b)
    assert jnp.allclose(out2, ref2, atol=2e-3, rtol=2e-3)

    print("KERNEL_OK")
</pallas_src>

<mosaic_0001>
module attributes {stable_mosaic.version = 11 : i64} {
  func.func @_dqn_kernel(%arg0: i32, %arg1: memref<8x32xf32, #tpu.memory_space<vmem>>, %arg2: memref<32x512xbf16, #tpu.memory_space<vmem>>, %arg3: memref<1x512xf32, #tpu.memory_space<vmem>>, %arg4: memref<512x128xbf16, #tpu.memory_space<vmem>>, %arg5: memref<1x128xf32, #tpu.memory_space<vmem>>, %arg6: memref<8x8xf32, #tpu.memory_space<vmem>>) attributes {dimension_semantics = [#tpu.dimension_semantics<parallel>], iteration_bounds = array<i64: 1>, scalar_prefetch = 0 : i64, scratch_operands = 0 : i64, tpu.core_type = #tpu.core_type<tc>, window_params = [{transform_indices = @transform_0, window_bounds = array<i64: 8, 32>}, {pipeline_mode = #tpu.pipeline_mode<synchronous>, transform_indices = @transform_1, window_bounds = array<i64: 32, 512>}, {pipeline_mode = #tpu.pipeline_mode<synchronous>, transform_indices = @transform_2, window_bounds = array<i64: 1, 512>}, {pipeline_mode = #tpu.pipeline_mode<synchronous>, transform_indices = @transform_3, window_bounds = array<i64: 512, 128>}, {pipeline_mode = #tpu.pipeline_mode<synchronous>, transform_indices = @transform_4, window_bounds = array<i64: 1, 128>}, {transform_indices = @transform_5, window_bounds = array<i64: 8, 8>}]} {
    %c0 = arith.constant 0 : index
    %c0_0 = arith.constant 0 : index
    %0 = vector.load %arg1[%c0, %c0_0] : memref<8x32xf32, #tpu.memory_space<vmem>>, vector<8x32xf32>
    %1 = arith.truncf %0 : vector<8x32xf32> to vector<8x32xbf16>
    %c0_1 = arith.constant 0 : index
    %c0_2 = arith.constant 0 : index
    %2 = vector.load %arg2[%c0_1, %c0_2] : memref<32x512xbf16, #tpu.memory_space<vmem>>, vector<32x512xbf16>
    %cst = arith.constant dense<0.000000e+00> : vector<8x512xf32>
    %3 = tpu.matmul %1, %2, %cst {dimension_numbers = #tpu.dot_dimension_numbers<[1], [0], [0], [1], [0, 0, 1, 1], [], []>} : vector<8x32xbf16>, vector<32x512xbf16>, vector<8x512xf32> -> vector<8x512xf32>
    %c0_3 = arith.constant 0 : index
    %c0_4 = arith.constant 0 : index
    %4 = vector.load %arg3[%c0_3, %c0_4] : memref<1x512xf32, #tpu.memory_space<vmem>>, vector<1x512xf32>
    %5 = vector.broadcast %4 : vector<1x512xf32> to vector<8x512xf32>
    %6 = arith.addf %3, %5 : vector<8x512xf32>
    %cst_5 = arith.constant 0.00999999977 : f32
    %7 = vector.broadcast %cst_5 : f32 to vector<8x512xf32>
    %8 = arith.mulf %7, %6 : vector<8x512xf32>
    %9 = arith.maximumf %6, %8 : vector<8x512xf32>
    %10 = arith.truncf %9 : vector<8x512xf32> to vector<8x512xbf16>
    %c0_6 = arith.constant 0 : index
    %c0_7 = arith.constant 0 : index
    %11 = vector.load %arg4[%c0_6, %c0_7] : memref<512x128xbf16, #tpu.memory_space<vmem>>, vector<512x128xbf16>
    %cst_8 = arith.constant dense<0.000000e+00> : vector<8x128xf32>
    %12 = tpu.matmul %10, %11, %cst_8 {dimension_numbers = #tpu.dot_dimension_numbers<[1], [0], [0], [1], [0, 0, 1, 1], [], []>} : vector<8x512xbf16>, vector<512x128xbf16>, vector<8x128xf32> -> vector<8x128xf32>
    %c0_9 = arith.constant 0 : index
    %c0_10 = arith.constant 0 : index
    %13 = vector.load %arg5[%c0_9, %c0_10] : memref<1x128xf32, #tpu.memory_space<vmem>>, vector<1x128xf32>
    %14 = vector.broadcast %13 : vector<1x128xf32> to vector<8x128xf32>
    %15 = arith.addf %12, %14 : vector<8x128xf32>
    %16 = vector.extract_strided_slice %15 {offsets = [0, 0], sizes = [8, 8], strides = [1, 1]} : vector<8x128xf32> to vector<8x8xf32>
    %c0_11 = arith.constant 0 : index
    %c0_12 = arith.constant 0 : index
    %17 = vector.load %arg6[%c0_11, %c0_12] : memref<8x8xf32, #tpu.memory_space<vmem>>, vector<8x8xf32>
    tpu.vector_store %arg6[%c0_11, %c0_12], %16 {strides = array<i32>} : memref<8x8xf32, #tpu.memory_space<vmem>>, vector<8x8xf32>,
    return
  }
  func.func @transform_0(%arg0: i32) -> (i32, i32) {
    %c0_i32 = arith.constant 0 : i32
    %c0_i32_0 = arith.constant 0 : i32
    return %arg0, %c0_i32 : i32, i32
  }
  func.func @transform_1(%arg0: i32) -> (i32, i32) {
    %c0_i32 = arith.constant 0 : i32
    %c0_i32_0 = arith.constant 0 : i32
    %c0_i32_1 = arith.constant 0 : i32
    return %c0_i32, %c0_i32_0 : i32, i32
  }
  func.func @transform_2(%arg0: i32) -> (i32, i32) {
    %c0_i32 = arith.constant 0 : i32
    %c0_i32_0 = arith.constant 0 : i32
    %c0_i32_1 = arith.constant 0 : i32
    return %c0_i32, %c0_i32_0 : i32, i32
  }
  func.func @transform_3(%arg0: i32) -> (i32, i32) {
    %c0_i32 = arith.constant 0 : i32
    %c0_i32_0 = arith.constant 0 : i32
    %c0_i32_1 = arith.constant 0 : i32
    return %c0_i32, %c0_i32_0 : i32, i32
  }
  func.func @transform_4(%arg0: i32) -> (i32, i32) {
    %c0_i32 = arith.constant 0 : i32
    %c0_i32_0 = arith.constant 0 : i32
    %c0_i32_1 = arith.constant 0 : i32
    return %c0_i32, %c0_i32_0 : i32, i32
  }
  func.func @transform_5(%arg0: i32) -> (i32, i32) {
    %c0_i32 = arith.constant 0 : i32
    %c0_i32_0 = arith.constant 0 : i32
    return %arg0, %c0_i32 : i32, i32
  }
}

</mosaic_0001>

<bundles_post_ra>
// kernel: dqn_forward.1
= control target key start
LH: loop header
LB: loop body
LE: loop exit
PB: predicated region body
PF: predicated region fallthrough
CT: control target
= control target key end

     0   :  { %10 = vsyncpa [#allocation3], 0  ;;  %s919_s0 = inlined_call_operand.hbm [shape: f32[8,32], index: 0, kind: input, shape index: {}]   ;;  %s920_s1 = inlined_call_operand.hbm [shape: bf16[32,512], index: 1, kind: input, shape index: {}]   ;;  %s921_s2 = inlined_call_operand.vmem [shape: f32[1,512], index: 2, kind: input, shape index: {}]   ;;  %s922_s3 = inlined_call_operand.hbm [shape: bf16[512,128], index: 3, kind: input, shape index: {}]   ;;  %s923_s4 = inlined_call_operand.vmem [shape: f32[1,128], index: 4, kind: input, shape index: {}]   ;;  %s924_s5 = inlined_call_operand.hbm [shape: f32[8,8], index: 5, kind: output, shape index: {}]  }
   0x1   :  { %11 = vsyncpa [#allocation6], 0 }
   0x2   :  { %12 = vsyncpa [#allocation4], 0  ;;  %s826_s18 = smov [#allocation5]   ;;  %s732_s22 = scalar_lea.hbm %s920_s1, 1024 }
   0x3   :  { %s28_s19 = sshll.u32 %s826_s18, 4  ;;  %p733_p0 = scmp.ne.s32.totalorder %s920_s1, %s732_s22  ;;  %s29_s19 = int_to_ptr.vmem [resolvable:$true] %s28_s19 }
   0x4   :  { %p736_p1 = scmp.lt.u32.totalorder %s732_s22, %s920_s1 }
   0x6   :  { %p738_p2 = pnand %p736_p1, %p733_p0 }
   0x8   :  { %741 = shalt.err (!%p738_p2)
}
   0x9   :  { %s742_s27 = scalar_lea.vmem %s29_s19, 1024  ;;  %p747_p4 = scmp.lt.s32.totalorder %s29_s19, %s29_s19 }
   0xa   :  { %p743_p3 = scmp.ne.s32.totalorder %s29_s19, %s742_s27  ;;  %p748_p5 = scmp.lt.s32.totalorder %s742_s27, %s742_s27 }
   0xc   :  { %p749_p6 = por %p748_p5, %p747_p4 }
   0xe   :  { %p750_p7 = pnand %p749_p6, %p743_p3 }
  0x10   :  { %753 = shalt.err (!%p750_p7)
}
  0x11   :  { %s827_s28 = smov 256   ;;  %s828_s29 = smov 16  }
  0x12   :  { %34 = dma.hbm_to_vmem [thread:$0]  %s920_s1, 1024, %s29_s19, [#allocation6], %s827_s28, %s827_s28, %s828_s29  }
  0x13   :  { %s829_s7 = smov [#allocation2]   ;;  %s830_s9 = smov [#allocation7]  }
  0x14   :  { %s19_s8 = sshll.u32 %s829_s7, 4  ;;  %s42_s10 = sshll.u32 %s830_s9, 4  ;;  %s20_s8 = int_to_ptr.vmem [resolvable:$true] %s19_s8  ;;  %s43_s10 = int_to_ptr.vmem [resolvable:$true] %s42_s10 }
  0x15   :  { %s754_s13 = scalar_lea.hbm %s919_s0, 128 }
  0x16   :  { %p755_p8 = scmp.ne.s32.totalorder %s919_s0, %s754_s13  ;;  %p758_p9 = scmp.lt.u32.totalorder %s754_s13, %s919_s0 }
  0x18   :  { %p760_p10 = pnand %p758_p9, %p755_p8 }
  0x1a   :  { %763 = shalt.err (!%p760_p10)
}
  0x1b   :  { %s764_s1 = scalar_lea.vmem %s20_s8, 128  ;;  %p769_p12 = scmp.lt.s32.totalorder %s20_s8, %s20_s8 }
  0x1c   :  { %p765_p11 = scmp.ne.s32.totalorder %s20_s8, %s764_s1  ;;  %p770_p13 = scmp.lt.s32.totalorder %s764_s1, %s764_s1 }
  0x1e   :  { %p771_p0 = por %p770_p13, %p769_p12 }
  0x20   :  { %p772_p1 = pnand %p771_p0, %p765_p11 }
  0x22   :  { %775 = shalt.err (!%p772_p1)
}
  0x23   :  { %22 = dma.hbm_to_vmem [thread:$0]  %s919_s0, 128, %s20_s8, [#allocation3]  }
  0x24   :  { %s776_s22 = scalar_lea.hbm %s922_s3, 4096 }
  0x25   :  { %p777_p2 = scmp.ne.s32.totalorder %s922_s3, %s776_s22  ;;  %p780_p3 = scmp.lt.u32.totalorder %s776_s22, %s922_s3 }
  0x27   :  { %p782_p4 = pnand %p780_p3, %p777_p2 }
  0x29   :  { %785 = shalt.err (!%p782_p4)
}
  0x2a   :  { %s786_s27 = scalar_lea.vmem %s43_s10, 4096  ;;  %p791_p6 = scmp.lt.s32.totalorder %s43_s10, %s43_s10 }
  0x2b   :  { %p787_p5 = scmp.ne.s32.totalorder %s43_s10, %s786_s27  ;;  %p792_p7 = scmp.lt.s32.totalorder %s786_s27, %s786_s27 }
  0x2d   :  { %p793_p8 = por %p792_p7, %p791_p6 }
  0x2f   :  { %p794_p9 = pnand %p793_p8, %p787_p5 }
  0x31   :  { %797 = shalt.err (!%p794_p9)
}
  0x32   :  { %s831_s0 = smov 64   ;;  %s832_s28 = smov 4  }
  0x33   :  { %48 = dma.hbm_to_vmem [thread:$0]  %s922_s3, 4096, %s43_s10, [#allocation6], %s831_s0, %s831_s0, %s832_s28  }
  0x34   :  { %820 = dma.done.wait [#allocation3], 128  }
  0x35   :  { %821 = vsyncadd [#allocation3], 4294967168 }
  0x36   :  { %822 = dma.done.wait [#allocation6], 5120  }
  0x37   :  { %823 = vsyncadd [#allocation6], 4294962176  ;;  %v833_v0 = vmov 0   ;;  %v688_v1 = vld [vmem:[#allocation5 + $0x4] ss:$16 sps:$4 sm:$0xff]   ;;  %v61_v9 = vld [vmem:[#allocation2] sm:$0xff]  ;;  %v73_v43 = vlaneseq }
  0x38   :  { %169 = vmatprep.mubr.bf16.mxu0 %v833_v0  ;;  %210 = vmatprep.mubr.bf16.mxu1 %v833_v0  ;;  %v690_v2 = vld [vmem:[#allocation5 + $0xc] ss:$16 sps:$4 sm:$0xff]   ;;  %v692_v3 = vld [vmem:[#allocation5] ss:$16 sps:$4 sm:$0xff]   ;;  %v693_v4 = vld [vmem:[#allocation5 + $0x8] ss:$16 sps:$4 sm:$0xff]   ;;  %v62_v11 = vpack.c.bf16 %v61_v9, %v61_v9 }
  0x39   :  { %137 = vmatprep.subr.bf16.mxu0 %v688_v1  ;;  %178 = vmatprep.subr.bf16.mxu1 %v690_v2  ;;  %v694_v5 = vld [vmem:[#allocation5 + $0x24] ss:$16 sps:$4 sm:$0xff]   ;;  %v696_v6 = vld [vmem:[#allocation5 + $0x2c] ss:$16 sps:$4 sm:$0xff]   ;;  %v698_v7 = vld [vmem:[#allocation5 + $0x20] ss:$16 sps:$4 sm:$0xff]  }
  0x3a   :  { %138 = vmatpush1.bf16.msra.mxu0 %v692_v3  ;;  %179 = vmatpush1.bf16.msra.mxu1 %v693_v4  ;;  %v699_v8 = vld [vmem:[#allocation5 + $0x28] ss:$16 sps:$4 sm:$0xff]   ;;  %v700_v10 = vld [vmem:[#allocation7 + $0x40] sm:$0xff]   ;;  %vm133_vm0 = vcmask 261120   ;;  %v708_v19 = vld [vmem:[#allocation7 + $0x50] sm:$0xff]   ;;  %v74_v44 = vshrl.u32 %v73_v43, 7 }
  0x3b   :  { %139 = vmatprep.subr.bf16.mxu0 %v694_v5  ;;  %180 = vmatprep.subr.bf16.mxu1 %v696_v6  ;;  %v701_v12 = vld [vmem:[#allocation7 + $0xc0] sm:$0xff]   ;;  %v704_v15 = vld [vmem:[#allocation7 + $0x48] sm:$0xff]   ;;  %v709_v20 = vld [vmem:[#allocation7 + $0xd0] sm:$0xff]   ;;  %s834_s8 = smov [#allocation8]   ;;  %vm574_vm1 = vcmask 64512  }
  0x3c   :  { %v702_v13 = vld [vmem:[#allocation7] sm:$0xff]   ;;  %v705_v16 = vld [vmem:[#allocation7 + $0xc8] sm:$0xff]   ;;  %v710_v21 = vld [vmem:[#allocation7 + $0x10] sm:$0xff]   ;;  %v75_v45 = vsub.s32 0, %v74_v44  ;;  %v83_v46 = vsub.s32 2, %v74_v44  ;;  %v79_v48 = vsub.s32 1, %v74_v44 }
  0x3d   :  { %v703_v14 = vld [vmem:[#allocation7 + $0x80] sm:$0xff]   ;;  %v706_v17 = vld [vmem:[#allocation7 + $0x8] sm:$0xff]   ;;  %v711_v22 = vld [vmem:[#allocation7 + $0x90] sm:$0xff]   ;;  %v87_v49 = vsub.s32 3, %v74_v44  ;;  %s582_s9 = sshll.u32 %s834_s8, 4  ;;  %s583_s9 = int_to_ptr.vmem [resolvable:$true] %s582_s9 }
  0x3e   :  { %140 = vmatpush1.bf16.msra.mxu0 %v698_v7  ;;  %181 = vmatpush1.bf16.msra.mxu1 %v699_v8  ;;  %v707_v18 = vld [vmem:[#allocation7 + $0x88] sm:$0xff]   ;;  %v712_v23 = vld [vmem:[#allocation7 + $0x58] sm:$0xff]   ;;  %v716_v27 = vld [vmem:[#allocation7 + $0x60] sm:$0xff]   ;;  %s798_s10 = scalar_lea.vmem %s583_s9, 128  ;;  %p803_p11 = scmp.lt.s32.totalorder %s583_s9, %s583_s9 }
  0x3f   :  { %635 = vmatprep.subr.bf16.mxu0 %v700_v10  ;;  %657 = vmatprep.subr.bf16.mxu1 %v701_v12  ;;  %v713_v24 = vld [vmem:[#allocation7 + $0xd8] sm:$0xff]   ;;  %v717_v28 = vld [vmem:[#allocation7 + $0xe0] sm:$0xff]   ;;  %v720_v31 = vld [vmem:[#allocation7 + $0x68] sm:$0xff]   ;;  %p799_p10 = scmp.ne.s32.totalorder %s583_s9, %s798_s10  ;;  %p804_p12 = scmp.lt.s32.totalorder %s798_s10, %s798_s10 }
  0x40   :  { %v714_v25 = vld [vmem:[#allocation7 + $0x18] sm:$0xff]   ;;  %v718_v29 = vld [vmem:[#allocation7 + $0x20] sm:$0xff]   ;;  %v721_v32 = vld [vmem:[#allocation7 + $0xe8] sm:$0xff]  }
  0x41   :  { %600 = vmatmul.mubr.msk.bf16.vlgmr.msra.gmra.mrb[0].mxu0 %vm133_vm0, %v62_v11  ;;  %601 = vmatmul.mubr.msk.bf16.vlgmr.msra.gmra.mrb[0].mxu1 %vm133_vm0, %v62_v11  ;;  %v715_v26 = vld [vmem:[#allocation7 + $0x98] sm:$0xff]   ;;  %v719_v30 = vld [vmem:[#allocation7 + $0xa0] sm:$0xff]   ;;  %v722_v33 = vld [vmem:[#allocation7 + $0x28] sm:$0xff]   ;;  %p805_p13 = por %p804_p12, %p803_p11 }
  0x42   :  { %636 = vmatpush3.bf16.msra.mxu0 %v702_v13  ;;  %658 = vmatpush3.bf16.msra.mxu1 %v703_v14  ;;  %v723_v34 = vld [vmem:[#allocation7 + $0xa8] sm:$0xff]   ;;  %v724_v35 = vld [vmem:[#allocation7 + $0x70] sm:$0xff]   ;;  %v728_v39 = vld [vmem:[#allocation7 + $0x78] sm:$0xff]  }
  0x43   :  { %637 = vmatprep.subr.bf16.mxu0 %v704_v15  ;;  %659 = vmatprep.subr.bf16.mxu1 %v705_v16  ;;  %v725_v36 = vld [vmem:[#allocation7 + $0xf0] sm:$0xff]   ;;  %v729_v40 = vld [vmem:[#allocation7 + $0xf8] sm:$0xff]   ;;  %p806_p0 = pnand %p805_p13, %p799_p10 }
  0x44   :  { %v726_v37 = vld [vmem:[#allocation7 + $0x30] sm:$0xff]   ;;  %v730_v41 = vld [vmem:[#allocation7 + $0x38] sm:$0xff]  }
  0x45   :  { %v727_v38 = vld [vmem:[#allocation7 + $0xb0] sm:$0xff]   ;;  %v731_v42 = vld [vmem:[#allocation7 + $0xb8] sm:$0xff]  }
  0x46   :  { %638 = vmatpush3.bf16.msra.mxu0 %v706_v17  ;;  %660 = vmatpush3.bf16.msra.mxu1 %v707_v18  ;;  %v71_v47 = vld [vmem:[%s921_s2] sm:$0xf] }
  0x47   :  { %639 = vmatprep.subr.bf16.mxu0 %v708_v19  ;;  %661 = vmatprep.subr.bf16.mxu1 %v709_v20  ;;  %v76_v50 = vrot.slane %v71_v47, %v75_v45  ;;  %v84_v51 = vrot.slane %v71_v47, %v83_v46  ;;  %v80_v52 = vrot.slane %v71_v47, %v79_v48  ;;  %v602_v16 = vld [vmem:[%s923_s4] ss:$0 sm:$0xff] }
  0x48   :  { %v88_v53 = vrot.slane %v71_v47, %v87_v49 }
  0x4a   :  { %640 = vmatpush3.bf16.msra.mxu0 %v710_v21  ;;  %662 = vmatpush3.bf16.msra.mxu1 %v711_v22 }
  0x4b   :  { %641 = vmatprep.subr.bf16.mxu0 %v712_v23  ;;  %663 = vmatprep.subr.bf16.mxu1 %v713_v24 }
  0x4e   :  { %642 = vmatpush3.bf16.msra.mxu0 %v714_v25  ;;  %664 = vmatpush3.bf16.msra.mxu1 %v715_v26 }
  0x4f   :  { %643 = vmatprep.subr.bf16.mxu0 %v716_v27  ;;  %665 = vmatprep.subr.bf16.mxu1 %v717_v28 }
  0x52   :  { %644 = vmatpush3.bf16.msra.mxu0 %v718_v29  ;;  %666 = vmatpush3.bf16.msra.mxu1 %v719_v30 }
  0x53   :  { %645 = vmatprep.subr.bf16.mxu0 %v720_v31  ;;  %667 = vmatprep.subr.bf16.mxu1 %v721_v32 }
  0x56   :  { %646 = vmatpush3.bf16.msra.mxu0 %v722_v33  ;;  %668 = vmatpush3.bf16.msra.mxu1 %v723_v34 }
  0x57   :  { %647 = vmatprep.subr.bf16.mxu0 %v724_v35  ;;  %669 = vmatprep.subr.bf16.mxu1 %v725_v36 }
  0x5a   :  { %648 = vmatpush3.bf16.msra.mxu0 %v726_v37  ;;  %670 = vmatpush3.bf16.msra.mxu1 %v727_v38 }
  0x5b   :  { %649 = vmatprep.subr.bf16.mxu0 %v728_v39  ;;  %671 = vmatprep.subr.bf16.mxu1 %v729_v40 }
  0x5e   :  { %650 = vmatpush3.bf16.msra.mxu0 %v730_v41  ;;  %672 = vmatpush3.bf16.msra.mxu1 %v731_v42 }
 0x114   :  { %v171_v54 = vpop.f32.mrb[0].mxu0  ;;  %v212_v55 = vpop.f32.mrb[0].mxu1 }
 0x115   :  { %v172_v56 = vadd.f32 %v171_v54, %v76_v50  ;;  %v213_v57 = vadd.f32 %v212_v55, %v84_v51  ;;  %v173_v58 = vpop.f32.mrb[1].mxu0  ;;  %v214_v59 = vpop.f32.mrb[1].mxu1 }
 0x116   :  { %v174_v60 = vadd.f32 %v173_v58, %v80_v52  ;;  %v215_v61 = vadd.f32 %v214_v59, %v88_v53  ;;  %v175_v62 = vpop.f32.mrb[2].mxu0  ;;  %v216_v63 = vpop.f32.mrb[2].mxu1 }
 0x117   :  { %v219_v0 = vmul.f32 0.01, %v172_v56  ;;  %v221_v1 = vmul.f32 0.01, %v213_v57  ;;  %v176_v2 = vpop.f32.mrb[3].mxu0  ;;  %v217_v3 = vpop.f32.mrb[3].mxu1 }
 0x118   :  { %v220_v4 = vmul.f32 0.01, %v174_v60  ;;  %v222_v5 = vmul.f32 0.01, %v215_v61 }
 0x119   :  { %v223_v6 = vmax.f32 %v172_v56, %v219_v0  ;;  %v225_v7 = vmax.f32 %v213_v57, %v221_v1 }
 0x11a   :  { %v224_v8 = vmax.f32 %v174_v60, %v220_v4  ;;  %v226_v9 = vmax.f32 %v215_v61, %v222_v5 }
 0x11b   :  { %v227_v12 = vpack.c.bf16 %v223_v6, %v223_v6  ;;  %v229_v13 = vpack.c.bf16 %v225_v7, %v225_v7 }
 0x11c   :  { %v228_v10 = vpack.c.bf16 %v224_v8, %v224_v8  ;;  %v230_v11 = vpack.c.bf16 %v226_v9, %v226_v9 }
 0x11e   :  { %526 = vmatprep.mubr.bf16.mxu0 %v228_v10  ;;  %566 = vmatprep.mubr.bf16.mxu1 %v230_v11 }
 0x11f   :  { %527 = vmatmul.mubr.bf16.vlgmr.msra.gmra.mrb[4].mxu0 %v227_v12  ;;  %567 = vmatmul.mubr.bf16.vlgmr.msra.gmra.mrb[4].mxu1 %v229_v13 }
 0x1f2   :  { %v651_v14 = vpop.f32.mrb[4].mxu0  ;;  %v673_v15 = vpop.f32.mrb[4].mxu1 }
 0x1f3   :  { %v652_v17 = vpop.f32.mrb[5].mxu0  ;;  %v674_v18 = vpop.f32.mrb[5].mxu1 }
 0x1f4   :  { %v653_v19 = vadd.f32 %v652_v17, %v651_v14  ;;  %v675_v20 = vadd.f32 %v674_v18, %v673_v15  ;;  %v654_v21 = vpop.f32.mrb[6].mxu0  ;;  %v676_v22 = vpop.f32.mrb[6].mxu1 }
 0x1f5   :  { %v655_v23 = vpop.f32.mrb[7].mxu0  ;;  %v677_v24 = vpop.f32.mrb[7].mxu1 }
 0x1f6   :  { %v529_v25 = vadd.f32 %v653_v19, %v602_v16 }
 0x1f8   :  { %v569_v26 = vadd.f32 %v675_v20, %v529_v25 }
 0x1fa   :  { %575 = vst.msk [vmem:[#allocation8] sm:$0xff] %vm574_vm1, %v569_v26 }
 0x1fb   :  { %809 = shalt.err (!%p806_p0)
}
 0x1fc   :  { %s810_s12 = scalar_lea.hbm %s924_s5, 128 }
 0x1fd   :  { %p811_p1 = scmp.ne.s32.totalorder %s924_s5, %s810_s12  ;;  %p814_p2 = scmp.lt.u32.totalorder %s810_s12, %s924_s5 }
 0x1ff   :  { %p816_p3 = pnand %p814_p2, %p811_p1 }
 0x201   :  { %819 = shalt.err (!%p816_p3)
}
 0x202   :  { %585 = dma.vmem_to_hbm [thread:$0]  %s583_s9, 128, %s924_s5, [#allocation4]  }
 0x203   :  { %824 = dma.done.wait [#allocation4], 128  }
 0x204   :  { %825 = vsyncadd [#allocation4], 4294967168 }
 0x205   :  { %589 = vsyncpa [#allocation3], 1 }
 0x206   :  { %590 = vsyncpa [#allocation6], 1 }
 0x207   :  { %591 = vsyncpa [#allocation4], 1 }

</bundles_post_ra>
